<compile_context>
chip_gen: v6e
topology: v6e:2x2x1
jax: 0.10.0
libtpu: 0.0.40
codegen_flags: <defaults>
</compile_context>

<pallas_src>
import functools

import jax
import jax.numpy as jnp
from jax.experimental import pallas as pl
from jax.experimental.pallas import tpu as pltpu

_LANES = 128          # vreg lane width
_SUBLANES = 8         # f32 sublane granularity
_MAX_TILE_ROWS = 4096  # 4096*128*4 B = 2 MiB per f32 tile; 8 MiB live double-buffered
_MIN_GRID_STEPS = 8    # keep >= ~8 steps on big inputs (megacore + pipeline overlap)


def _round_up(n, m):
    return ((n + m - 1) // m) * m


def simplenet_kernel(w_ref, b_ref, x_ref, o_ref):
    # w_ref, b_ref: (1,) f32 scalars in SMEM, pre-scaled by 0.5 in the wrapper.
    # x_ref, o_ref: (tile_r, 128) f32 tiles in VMEM.
    wh = w_ref[0]                      # 0.5 * w
    bh = b_ref[0]                      # 0.5 * b
    zh = x_ref[...] * wh + bh          # VPU: 0.5 * (w*x + b)
    # sigmoid(z) = 0.5 * tanh(z / 2) + 0.5  -> single EUP transcendental,
    # accurate to a few ULP (unlike pl.reciprocal(approx=True)).
    o_ref[...] = 0.5 * jnp.tanh(zh) + 0.5


def _run_tiled(x2, w_half, b_half, tile_rows):
    rows = x2.shape[0]
    # Tile height: big enough to amortize per-step overhead (multi-MiB steps),
    # small enough that large inputs still get >= _MIN_GRID_STEPS grid steps.
    tile_r = min(tile_rows,
                 max(_SUBLANES, _round_up(pl.cdiv(rows, _MIN_GRID_STEPS), _SUBLANES)))
    grid = (pl.cdiv(rows, tile_r),)
    return pl.pallas_call(
        simplenet_kernel,
        out_shape=jax.ShapeDtypeStruct((rows, _LANES), jnp.float32),
        grid=grid,
        in_specs=[
            pl.BlockSpec(memory_space=pltpu.MemorySpace.SMEM),   # 0.5*w scalar
            pl.BlockSpec(memory_space=pltpu.MemorySpace.SMEM),   # 0.5*b scalar
            pl.BlockSpec((tile_r, _LANES), lambda i: (i, 0)),    # x row tile
        ],
        out_specs=pl.BlockSpec((tile_r, _LANES), lambda i: (i, 0)),
        compiler_params=pltpu.CompilerParams(
            dimension_semantics=("parallel",),   # megacore sharding on v7x
        ),
    )(w_half, b_half, x2)


@functools.partial(jax.jit, static_argnames=("tile_rows",))
def simplenet_forward(x, w, b, *, tile_rows=_MAX_TILE_ROWS):
    """x: (N, 1) f32, w: (1, 1) f32, b: (1,) f32 -> (N, 1) f32.

    out = sigmoid(x @ w.T + b), identical to SimpleNet.forward.
    """
    orig_shape = x.shape
    xf = x.reshape(-1).astype(jnp.float32)
    total = xf.shape[0]

    # Fold the tanh-sigmoid 0.5 scaling into the SMEM scalars (free in wrapper).
    w_half = (0.5 * w.reshape(-1)).astype(jnp.float32)   # (1,)
    b_half = (0.5 * b.reshape(-1)).astype(jnp.float32)   # (1,)

    if total % (_SUBLANES * _LANES) == 0:
        # Fully (8,128)-aligned fast path: free reshape, no pad, no slice.
        x2 = xf.reshape(total // _LANES, _LANES)
        out2 = _run_tiled(x2, w_half, b_half, tile_rows)
        return out2.reshape(orig_shape)

    # Ragged fallback: pad flat array up to whole (8,128)-aligned rows,
    # slice the tail off afterwards.  Padded lanes compute sigmoid(b) and
    # are discarded; purely elementwise so this is safe.
    rows = _round_up(pl.cdiv(total, _LANES), _SUBLANES)
    x2 = jnp.pad(xf, (0, rows * _LANES - total)).reshape(rows, _LANES)
    out2 = _run_tiled(x2, w_half, b_half, tile_rows)
    return out2.reshape(-1)[:total].reshape(orig_shape)


if __name__ == "__main__":
    key = jax.random.PRNGKey(0)
    kx, kw, kb = jax.random.split(key, 3)

    # Batch of scalar samples for nn.Linear(1, 1); 1024 exercises the
    # zero-copy lane-aligned fast path.
    N = 1024
    x = jax.random.normal(kx, (N, 1), dtype=jnp.float32)

    # Deterministic parameter init (mimics nn.Linear's uniform init for
    # in_features=1; exact values don't matter, just deterministic).
    w = jax.random.uniform(kw, (1, 1), dtype=jnp.float32, minval=-1.0, maxval=1.0)
    b = jax.random.uniform(kb, (1,), dtype=jnp.float32, minval=-1.0, maxval=1.0)

    out = jax.block_until_ready(simplenet_forward(x, w, b))
    ref = jax.nn.sigmoid(x @ w.T + b)
    assert out.shape == (N, 1)
    assert jnp.allclose(out, ref, atol=1e-6), "mismatch vs reference (aligned path)"

    # Ragged batch exercises the padded fallback path.
    N2 = 13
    x_r = jax.random.normal(kx, (N2, 1), dtype=jnp.float32)
    out_r = jax.block_until_ready(simplenet_forward(x_r, w, b))
    ref_r = jax.nn.sigmoid(x_r @ w.T + b)
    assert out_r.shape == (N2, 1)
    assert jnp.allclose(out_r, ref_r, atol=1e-6), "mismatch vs reference (ragged path)"

    print("KERNEL_OK")
</pallas_src>

<mosaic_0001>
module attributes {stable_mosaic.version = 11 : i64} {
  func.func @simplenet_kernel(%arg0: i32, %arg1: memref<1xf32, #tpu.memory_space<smem>>, %arg2: memref<1xf32, #tpu.memory_space<smem>>, %arg3: memref<8x128xf32, #tpu.memory_space<vmem>>, %arg4: memref<8x128xf32, #tpu.memory_space<vmem>>) attributes {dimension_semantics = [#tpu.dimension_semantics<parallel>], iteration_bounds = array<i64: 1>, scalar_prefetch = 0 : i64, scratch_operands = 0 : i64, tpu.core_type = #tpu.core_type<tc>, window_params = [{transform_indices = @transform_0, window_bounds = array<i64: 1>}, {transform_indices = @transform_1, window_bounds = array<i64: 1>}, {transform_indices = @transform_2, window_bounds = array<i64: 8, 128>}, {transform_indices = @transform_3, window_bounds = array<i64: 8, 128>}]} {
    %c0 = arith.constant 0 : index
    %0 = memref.load %arg1[%c0] : memref<1xf32, #tpu.memory_space<smem>>
    %c0_0 = arith.constant 0 : index
    %1 = memref.load %arg2[%c0_0] : memref<1xf32, #tpu.memory_space<smem>>
    %c0_1 = arith.constant 0 : index
    %c0_2 = arith.constant 0 : index
    %2 = vector.load %arg3[%c0_1, %c0_2] : memref<8x128xf32, #tpu.memory_space<vmem>>, vector<8x128xf32>
    %3 = vector.broadcast %0 : f32 to vector<8x128xf32>
    %4 = arith.mulf %2, %3 : vector<8x128xf32>
    %5 = vector.broadcast %1 : f32 to vector<8x128xf32>
    %6 = arith.addf %4, %5 : vector<8x128xf32>
    %7 = math.tanh %6 : vector<8x128xf32>
    %cst = arith.constant 5.000000e-01 : f32
    %8 = vector.broadcast %cst : f32 to vector<8x128xf32>
    %9 = arith.mulf %8, %7 : vector<8x128xf32>
    %cst_3 = arith.constant 5.000000e-01 : f32
    %10 = vector.broadcast %cst_3 : f32 to vector<8x128xf32>
    %11 = arith.addf %9, %10 : vector<8x128xf32>
    %c0_4 = arith.constant 0 : index
    %c0_5 = arith.constant 0 : index
    %12 = vector.load %arg4[%c0_4, %c0_5] : memref<8x128xf32, #tpu.memory_space<vmem>>, vector<8x128xf32>
    tpu.vector_store %arg4[%c0_4, %c0_5], %11 {strides = array<i32>} : memref<8x128xf32, #tpu.memory_space<vmem>>, vector<8x128xf32>,
    return
  }
  func.func @transform_0(%arg0: i32) -> i32 {
    %c0_i32 = arith.constant 0 : i32
    %c0_i32_0 = arith.constant 0 : i32
    return %c0_i32 : i32
  }
  func.func @transform_1(%arg0: i32) -> i32 {
    %c0_i32 = arith.constant 0 : i32
    %c0_i32_0 = arith.constant 0 : i32
    return %c0_i32 : i32
  }
  func.func @transform_2(%arg0: i32) -> (i32, i32) {
    %c0_i32 = arith.constant 0 : i32
    %c0_i32_0 = arith.constant 0 : i32
    return %arg0, %c0_i32 : i32, i32
  }
  func.func @transform_3(%arg0: i32) -> (i32, i32) {
    %c0_i32 = arith.constant 0 : i32
    %c0_i32_0 = arith.constant 0 : i32
    return %arg0, %c0_i32 : i32, i32
  }
}

</mosaic_0001>

<bundles_post_ra>
// kernel: simplenet_forward.1
= control target key start
LH: loop header
LB: loop body
LE: loop exit
PB: predicated region body
PF: predicated region fallthrough
CT: control target
= control target key end

     0   :  { %s100_s0 = inlined_call_operand.<no memory space> [shape: f32[1], index: 0, kind: input, shape index: {}]   ;;  %s101_s1 = inlined_call_operand.<no memory space> [shape: f32[1], index: 1, kind: input, shape index: {}]   ;;  %s102_s2 = inlined_call_operand.vmem [shape: f32[8,128], index: 2, kind: input, shape index: {}]   ;;  %s103_s3 = inlined_call_operand.hbm [shape: f32[8,128], index: 3, kind: output, shape index: {}]  }
   0x1   :  { %v19_v0 = vld [vmem:[%s102_s2] sm:$0xff]  ;;  %v20_v1 = vstv %s100_s0  ;;  %v22_v2 = vstv %s101_s1 }
   0x2   :  { %10 = vsyncpa [#allocation5], 0  ;;  %v21_v3 = vmul.f32 %v20_v1, %v19_v0  ;;  %s67_s18 = smov [#allocation4]  }
   0x3   :  { %s34_s19 = sshll.u32 %s67_s18, 4  ;;  %s35_s19 = int_to_ptr.vmem [resolvable:$true] %s34_s19 }
   0x4   :  { %v23_v4 = vadd.f32 %v22_v2, %v21_v3  ;;  %s45_s2 = scalar_lea.vmem %s35_s19, 128  ;;  %p50_p1 = scmp.lt.s32.totalorder %s35_s19, %s35_s19 }
   0x5   :  { %p46_p0 = scmp.ne.s32.totalorder %s35_s19, %s45_s2  ;;  %p51_p2 = scmp.lt.s32.totalorder %s45_s2, %s45_s2 }
   0x6   :  { %43 = vtanh.f32 %v23_v4 }
   0x7   :  { %p52_p3 = por %p51_p2, %p50_p1 }
   0x9   :  { %p53_p4 = pnand %p52_p3, %p46_p0 }
  0x13   :  { %v44_v5 = vpop.eup %43 }
  0x14   :  { %v25_v6 = vmul.f32 0.5, %v44_v5 }
  0x16   :  { %v26_v7 = vadd.f32 0.5, %v25_v6 }
  0x18   :  { %27 = vst [vmem:[#allocation4] sm:$0xff] %v26_v7 }
  0x19   :  { %56 = shalt.err (!%p53_p4)
}
  0x1a   :  { %37 = dma.vmem_to_hbm [thread:$0]  %s35_s19, 128, %s103_s3, [#allocation5]  }
  0x1b   :  { %65 = dma.done.wait [#allocation5], 128  }
  0x1c   :  { %66 = vsyncadd [#allocation5], 4294967168 }
  0x1d   :  { %41 = vsyncpa [#allocation5], 1 }

</bundles_post_ra>
